<compile_context>
chip_gen: v7x
topology: tpu7x:2x2x1
jax: 0.10.0
libtpu: 0.0.40
codegen_flags: <defaults>
</compile_context>

<pallas_src>
import functools

import jax
import jax.numpy as jnp
from jax.experimental import pallas as pl
from jax.experimental.pallas import tpu as pltpu

_LANE = 128
_SUBLANE = 8
_MXU_ROWS = 256


def _round_up(x, m):
    return (x + m - 1) // m * m


def _gelu_exact(x):
    # matches torch.nn.GELU() default (erf-based, not tanh approx)
    return 0.5 * x * (1.0 + jax.lax.erf(x * 0.7071067811865476))


@functools.lru_cache(maxsize=None)
def _vmem_capacity_bytes():
    try:
        return int(pltpu.get_tpu_info().vmem_capacity_bytes)
    except Exception:  # pragma: no cover - conservative fallback (v7x-sized)
        return 64 * 1024 * 1024


def _vmem_limit(est_bytes):
    """Always set an explicit scoped-VMEM limit:
    >= 32 MiB (covers v5e's 16 MiB default being too small), <= physical - headroom."""
    cap_phys = _vmem_capacity_bytes()
    cap = min(cap_phys - (8 << 20), int(cap_phys * 0.85))
    want = int(est_bytes) + (4 << 20)
    return int(max(min(want, cap), min(32 << 20, cap)))


def _pick_tm(M, tm):
    """M-tile: multiple of 256 rows (full MXU pass on v6e/v7x), even tile count
    when possible so both v7x TensorCores get equal work."""
    M8 = _round_up(M, _SUBLANE)
    if M8 <= _MXU_ROWS:
        return M8                                    # single small tile
    # 512-row tiles only when there is enough work and enough VMEM (v5e/v6e).
    if _vmem_capacity_bytes() < (96 << 20) or M8 < 1024:
        tm = min(tm, _MXU_ROWS)
    tm_max = max(_MXU_ROWS, _round_up(min(tm, M8), _MXU_ROWS))
    for cand in range(tm_max, _MXU_ROWS - 1, -_MXU_ROWS):
        if pl.cdiv(M8, cand) % 2 == 0:               # even #tiles -> both TCs busy
            return cand
    return _MXU_ROWS


# ----------------------------------------------------------------------------
# Pallas kernels
# ----------------------------------------------------------------------------
def _repa_mlp_kernel(x_ref, wc_ref, bc_ref, w3_ref, o_ref):
    dim_p = o_ref.shape[-1]
    x = x_ref[...]
    if x.dtype != wc_ref.dtype:                      # optional bf16-weight mode
        x = x.astype(wc_ref.dtype)
    # One fused MXU pass over the concatenated RHS [W1 | W2]; f32 accumulation.
    y = jnp.dot(x, wc_ref[...], preferred_element_type=jnp.float32)
    y = y + bc_ref[...].astype(jnp.float32)          # single fused bias add
    skip = y[:, :dim_p]                              # x @ W1 + b1
    a = _gelu_exact(y[:, dim_p:])                    # exact GELU of x @ W2 + b2
    out = skip + jnp.dot(a.astype(w3_ref.dtype), w3_ref[...],
                         preferred_element_type=jnp.float32)
    o_ref[...] = out.astype(o_ref.dtype)


def _linear_kernel(x_ref, w_ref, b_ref, o_ref):
    x = x_ref[...]
    if x.dtype != w_ref.dtype:
        x = x.astype(w_ref.dtype)
    y = jnp.dot(x, w_ref[...], preferred_element_type=jnp.float32)
    o_ref[...] = (y + b_ref[...].astype(jnp.float32)).astype(o_ref.dtype)


# ----------------------------------------------------------------------------
# One-time weight preparation (hoisted out of the per-call forward)
# ----------------------------------------------------------------------------
def repa_mlp_prepare(W1, b1, W2=None, b2=None, W3=None, *, act_channels,
                     param_dtype=None):
    """Pad / concatenate / cast the reparameterized weights ONCE.

    Weights are [in, out] layout (as produced by repa_mlp_params).
    `param_dtype=jnp.bfloat16` enables the bf16-MXU weight path (changes numerics).
    Returns (WC, bC, W3p) to pass to repa_mlp_forward (W3p is None if ac == 0).
    """
    dim = W1.shape[0]
    dim_p = _round_up(dim, _LANE)
    if param_dtype is None:
        param_dtype = W1.dtype
    W1p = jnp.pad(W1, ((0, dim_p - dim), (0, dim_p - dim)))
    b1p = jnp.pad(b1, (0, dim_p - dim))
    if act_channels == 0:
        return (W1p.astype(param_dtype),
                b1p.reshape(1, dim_p).astype(jnp.float32),
                None)
    ac = act_channels
    ac_p = _round_up(ac, _LANE)
    # Padding is inert: gelu(0) = 0 and the padded W3 rows are zero.
    W2p = jnp.pad(W2, ((0, dim_p - dim), (0, ac_p - ac)))
    b2p = jnp.pad(b2, (0, ac_p - ac))
    W3p = jnp.pad(W3, ((0, ac_p - ac), (0, dim_p - dim)))
    WC = jnp.concatenate([W1p, W2p], axis=1).astype(param_dtype)
    bC = jnp.concatenate([b1p, b2p]).reshape(1, dim_p + ac_p).astype(jnp.float32)
    return WC, bC, W3p.astype(param_dtype)


# ----------------------------------------------------------------------------
# Forward
# ----------------------------------------------------------------------------
@functools.partial(jax.jit, static_argnames=("tm",))
def repa_mlp_forward(x, WC, bC, W3=None, *, tm=512):
    """x: (..., dim). WC/bC/W3 from repa_mlp_prepare. Returns x.shape / x.dtype."""
    orig_shape = x.shape
    dim = orig_shape[-1]
    x2 = x.reshape(-1, dim)
    M = x2.shape[0]

    dim_p = WC.shape[0]
    nc = WC.shape[1]                     # dim_p (ac==0) or dim_p + ac_p
    has_gelu = W3 is not None
    ac_p = (nc - dim_p) if has_gelu else 0

    w_item = jnp.dtype(WC.dtype).itemsize
    x_item = jnp.dtype(x.dtype).itemsize

    tm_eff = _pick_tm(M, tm)

    # Only copy/pad the activations when the feature dim needs lane padding.
    # A ragged last M tile is handled by the grid (masked boundary block), so
    # lane-aligned ViT widths (768/1024/1280) never pay an extra HBM pass.
    if dim_p != dim:
        m_pad = _round_up(M, tm_eff)
        x_in = jnp.pad(x2, ((0, m_pad - M), (0, dim_p - dim)))
    else:
        x_in = x2
    M_in = x_in.shape[0]
    grid = (pl.cdiv(M_in, tm_eff),)

    # VMEM estimate: double-buffered weights + x/out tiles + f32 temporaries
    # (fused y, gelu branch, skip/accumulator).
    est = (2 * w_item * (dim_p * nc + ac_p * dim_p)
           + 2 * 4 * nc
           + 2 * tm_eff * dim_p * (x_item + x_item)
           + 4 * tm_eff * (nc + ac_p + dim_p))
    compiler_params = pltpu.CompilerParams(
        dimension_semantics=("parallel",),
        vmem_limit_bytes=_vmem_limit(est),
    )
    cost = pl.CostEstimate(
        flops=2 * M * dim_p * nc + 2 * M * ac_p * dim_p,
        transcendentals=M * ac_p,
        bytes_accessed=(w_item * (dim_p * nc + ac_p * dim_p) + 4 * nc
                        + 2 * M * dim * x_item),
    )

    if has_gelu:
        kernel = _repa_mlp_kernel
        in_specs = [
            pl.BlockSpec((tm_eff, dim_p), lambda i: (i, 0)),   # x tile
            pl.BlockSpec((dim_p, nc), lambda i: (0, 0)),       # [W1 | W2] resident
            pl.BlockSpec((1, nc), lambda i: (0, 0)),           # [b1 | b2]
            pl.BlockSpec((ac_p, dim_p), lambda i: (0, 0)),     # W3 resident
        ]
        args = (x_in, WC, bC, W3)
    else:
        kernel = _linear_kernel
        in_specs = [
            pl.BlockSpec((tm_eff, dim_p), lambda i: (i, 0)),
            pl.BlockSpec((dim_p, nc), lambda i: (0, 0)),
            pl.BlockSpec((1, nc), lambda i: (0, 0)),
        ]
        args = (x_in, WC, bC)

    out = pl.pallas_call(
        kernel,
        out_shape=jax.ShapeDtypeStruct((M_in, dim_p), x.dtype),
        grid_spec=pl.GridSpec(
            grid=grid,
            in_specs=in_specs,
            out_specs=pl.BlockSpec((tm_eff, dim_p), lambda i: (i, 0)),
        ),
        compiler_params=compiler_params,
        cost_estimate=cost,
    )(*args)

    if dim_p != dim or M_in != M:
        out = out[:M, :dim]
    return out.reshape(orig_shape)


# ----------------------------------------------------------------------------
# Reparameterization (mirrors RePaMlp.__init__, plain-JAX glue, f32 math)
# ----------------------------------------------------------------------------
def repa_mlp_params(fc1_weight, fc1_bias, fc2_weight, fc2_bias, act_channels):
    """fc1_weight: (hidden, dim), fc1_bias: (hidden,),
    fc2_weight: (dim, hidden), fc2_bias: (dim,).
    Returns weights in [in, out] layout for the kernel."""
    dim = fc1_weight.shape[1]
    ac = act_channels
    if ac == 0:
        W1 = fc1_weight.T @ fc2_weight.T + jnp.eye(dim, dtype=fc1_weight.dtype)
        b1 = fc1_bias @ fc2_weight.T + fc2_bias
        return W1, b1, None, None, None
    W1 = fc1_weight[ac:, :].T @ fc2_weight[:, ac:].T + jnp.eye(
        dim, dtype=fc1_weight.dtype
    )
    b1 = fc1_bias[ac:] @ fc2_weight[:, ac:].T + fc2_bias
    W2 = fc1_weight[:ac, :].T          # (dim, ac)  -> fc2(x) = x @ W2 + b2
    b2 = fc1_bias[:ac]                 # (ac,)
    W3 = fc2_weight[:, :ac].T          # (ac, dim)  -> fc3(h) = h @ W3
    return W1, b1, W2, b2, W3


# ----------------------------------------------------------------------------
# Pure-JAX reference for verification
# ----------------------------------------------------------------------------
def repa_mlp_reference(x, W1, b1, W2, b2, W3, act_channels):
    if act_channels == 0:
        return x @ W1 + b1
    return _gelu_exact(x @ W2 + b2) @ W3 + x @ W1 + b1


if __name__ == "__main__":
    key = jax.random.PRNGKey(0)
    ks = jax.random.split(key, 8)

    # --- Case 1: small unaligned dim (dim=32, hidden=64, idle_ratio=0.75) ------
    batch, seq, dim, hidden = 2, 8, 32, 64
    act_channels = int(hidden * (1 - 0.75))   # = 16

    fc1_weight = jax.random.normal(ks[0], (hidden, dim), jnp.float32) * 0.05
    fc1_bias = jax.random.normal(ks[1], (hidden,), jnp.float32) * 0.05
    fc2_weight = jax.random.normal(ks[2], (dim, hidden), jnp.float32) * 0.05
    fc2_bias = jax.random.normal(ks[3], (dim,), jnp.float32) * 0.05
    x = jax.random.normal(ks[4], (batch, seq, dim), jnp.float32)

    # act_channels > 0 path
    W1, b1, W2, b2, W3 = repa_mlp_params(
        fc1_weight, fc1_bias, fc2_weight, fc2_bias, act_channels)
    WC, bC, W3p = repa_mlp_prepare(W1, b1, W2, b2, W3, act_channels=act_channels)
    out = jax.block_until_ready(repa_mlp_forward(x, WC, bC, W3p))
    ref = repa_mlp_reference(
        x.reshape(-1, dim), W1, b1, W2, b2, W3, act_channels).reshape(x.shape)
    assert out.shape == x.shape and out.dtype == x.dtype
    assert jnp.allclose(out, ref, atol=1e-5, rtol=1e-5), "mismatch (ac>0)"

    # act_channels == 0 path
    W1z, b1z, _, _, _ = repa_mlp_params(fc1_weight, fc1_bias, fc2_weight, fc2_bias, 0)
    WCz, bCz, _ = repa_mlp_prepare(W1z, b1z, act_channels=0)
    out0 = jax.block_until_ready(repa_mlp_forward(x, WCz, bCz, None))
    ref0 = repa_mlp_reference(
        x.reshape(-1, dim), W1z, b1z, None, None, None, 0).reshape(x.shape)
    assert out0.shape == x.shape and out0.dtype == x.dtype
    assert jnp.allclose(out0, ref0, atol=1e-5, rtol=1e-5), "mismatch (ac=0)"

    # --- Case 2: lane-aligned dim with a ragged M tail (no-pad fast path) ------
    batch2, seq2, dim2, hidden2 = 3, 90, 128, 256
    ac2 = int(hidden2 * (1 - 0.5))            # = 128
    f1w = jax.random.normal(ks[5], (hidden2, dim2), jnp.float32) * 0.03
    f1b = jax.random.normal(ks[6], (hidden2,), jnp.float32) * 0.03
    f2w = jax.random.normal(ks[7], (dim2, hidden2), jnp.float32) * 0.03
    f2b = jnp.zeros((dim2,), jnp.float32)
    x_big = jax.random.normal(jax.random.PRNGKey(1), (batch2, seq2, dim2), jnp.float32)

    V1, c1, V2, c2, V3 = repa_mlp_params(f1w, f1b, f2w, f2b, ac2)
    VC, cC, V3p = repa_mlp_prepare(V1, c1, V2, c2, V3, act_channels=ac2)
    out2 = jax.block_until_ready(repa_mlp_forward(x_big, VC, cC, V3p))
    ref2 = repa_mlp_reference(
        x_big.reshape(-1, dim2), V1, c1, V2, c2, V3, ac2).reshape(x_big.shape)
    assert out2.shape == x_big.shape and out2.dtype == x_big.dtype
    assert jnp.allclose(out2, ref2, atol=2e-4, rtol=2e-4), "mismatch (ragged M)"

    print("KERNEL_OK")
</pallas_src>

<mosaic_0001>
module attributes {stable_mosaic.version = 11 : i64} {
  func.func @_repa_mlp_kernel(%arg0: i32, %arg1: memref<16x128xf32, #tpu.memory_space<vmem>>, %arg2: memref<128x256xf32, #tpu.memory_space<vmem>>, %arg3: memref<1x256xf32, #tpu.memory_space<vmem>>, %arg4: memref<128x128xf32, #tpu.memory_space<vmem>>, %arg5: memref<16x128xf32, #tpu.memory_space<vmem>>) attributes {dimension_semantics = [#tpu.dimension_semantics<parallel>], iteration_bounds = array<i64: 1>, scalar_prefetch = 0 : i64, scratch_operands = 0 : i64, tpu.core_type = #tpu.core_type<tc>, window_params = [{transform_indices = @transform_0, window_bounds = array<i64: 16, 128>}, {pipeline_mode = #tpu.pipeline_mode<synchronous>, transform_indices = @transform_1, window_bounds = array<i64: 128, 256>}, {pipeline_mode = #tpu.pipeline_mode<synchronous>, transform_indices = @transform_2, window_bounds = array<i64: 1, 256>}, {pipeline_mode = #tpu.pipeline_mode<synchronous>, transform_indices = @transform_3, window_bounds = array<i64: 128, 128>}, {transform_indices = @transform_4, window_bounds = array<i64: 16, 128>}]} {
    %c0 = arith.constant 0 : index
    %c0_0 = arith.constant 0 : index
    %0 = vector.load %arg1[%c0, %c0_0] : memref<16x128xf32, #tpu.memory_space<vmem>>, vector<16x128xf32>
    %c0_1 = arith.constant 0 : index
    %c0_2 = arith.constant 0 : index
    %1 = vector.load %arg2[%c0_1, %c0_2] : memref<128x256xf32, #tpu.memory_space<vmem>>, vector<128x256xf32>
    %cst = arith.constant dense<0.000000e+00> : vector<16x256xf32>
    %2 = tpu.matmul %0, %1, %cst {dimension_numbers = #tpu.dot_dimension_numbers<[1], [0], [0], [1], [0, 0, 1, 1], [], []>} : vector<16x128xf32>, vector<128x256xf32>, vector<16x256xf32> -> vector<16x256xf32>
    %c0_3 = arith.constant 0 : index
    %c0_4 = arith.constant 0 : index
    %3 = vector.load %arg3[%c0_3, %c0_4] : memref<1x256xf32, #tpu.memory_space<vmem>>, vector<1x256xf32>
    %4 = vector.broadcast %3 : vector<1x256xf32> to vector<16x256xf32>
    %5 = arith.addf %2, %4 : vector<16x256xf32>
    %6 = vector.extract_strided_slice %5 {offsets = [0, 0], sizes = [16, 128], strides = [1, 1]} : vector<16x256xf32> to vector<16x128xf32>
    %7 = vector.extract_strided_slice %5 {offsets = [0, 128], sizes = [16, 128], strides = [1, 1]} : vector<16x256xf32> to vector<16x128xf32>
    %cst_5 = arith.constant 5.000000e-01 : f32
    %8 = vector.broadcast %cst_5 : f32 to vector<16x128xf32>
    %9 = arith.mulf %8, %7 : vector<16x128xf32>
    %cst_6 = arith.constant 0.707106769 : f32
    %10 = vector.broadcast %cst_6 : f32 to vector<16x128xf32>
    %11 = arith.mulf %7, %10 : vector<16x128xf32>
    %12 = math.erf %11 : vector<16x128xf32>
    %cst_7 = arith.constant 1.000000e+00 : f32
    %13 = vector.broadcast %cst_7 : f32 to vector<16x128xf32>
    %14 = arith.addf %13, %12 : vector<16x128xf32>
    %15 = arith.mulf %9, %14 : vector<16x128xf32>
    %c0_8 = arith.constant 0 : index
    %c0_9 = arith.constant 0 : index
    %16 = vector.load %arg4[%c0_8, %c0_9] : memref<128x128xf32, #tpu.memory_space<vmem>>, vector<128x128xf32>
    %cst_10 = arith.constant dense<0.000000e+00> : vector<16x128xf32>
    %17 = tpu.matmul %15, %16, %cst_10 {dimension_numbers = #tpu.dot_dimension_numbers<[1], [0], [0], [1], [0, 0, 1, 1], [], []>} : vector<16x128xf32>, vector<128x128xf32>, vector<16x128xf32> -> vector<16x128xf32>
    %18 = arith.addf %6, %17 : vector<16x128xf32>
    %c0_11 = arith.constant 0 : index
    %c0_12 = arith.constant 0 : index
    %19 = vector.load %arg5[%c0_11, %c0_12] : memref<16x128xf32, #tpu.memory_space<vmem>>, vector<16x128xf32>
    tpu.vector_store %arg5[%c0_11, %c0_12], %18 {strides = array<i32>} : memref<16x128xf32, #tpu.memory_space<vmem>>, vector<16x128xf32>,
    return
  }
  func.func @transform_0(%arg0: i32) -> (i32, i32) {
    %c0_i32 = arith.constant 0 : i32
    %c0_i32_0 = arith.constant 0 : i32
    return %arg0, %c0_i32 : i32, i32
  }
  func.func @transform_1(%arg0: i32) -> (i32, i32) {
    %c0_i32 = arith.constant 0 : i32
    %c0_i32_0 = arith.constant 0 : i32
    %c0_i32_1 = arith.constant 0 : i32
    return %c0_i32, %c0_i32_0 : i32, i32
  }
  func.func @transform_2(%arg0: i32) -> (i32, i32) {
    %c0_i32 = arith.constant 0 : i32
    %c0_i32_0 = arith.constant 0 : i32
    %c0_i32_1 = arith.constant 0 : i32
    return %c0_i32, %c0_i32_0 : i32, i32
  }
  func.func @transform_3(%arg0: i32) -> (i32, i32) {
    %c0_i32 = arith.constant 0 : i32
    %c0_i32_0 = arith.constant 0 : i32
    %c0_i32_1 = arith.constant 0 : i32
    return %c0_i32, %c0_i32_0 : i32, i32
  }
  func.func @transform_4(%arg0: i32) -> (i32, i32) {
    %c0_i32 = arith.constant 0 : i32
    %c0_i32_0 = arith.constant 0 : i32
    return %arg0, %c0_i32 : i32, i32
  }
}

</mosaic_0001>

<bundles_post_ra>
// kernel: repa_mlp_forward.1
= control target key start
LH: loop header
LB: loop body
LE: loop exit
PB: predicated region body
PF: predicated region fallthrough
CT: control target
= control target key end

     0   :  { %9 = vsyncpa [#allocation3], 0  ;;  %s528_s0 = inlined_call_operand.vmem [shape: f32[16,128], index: 0, kind: input, shape index: {}]   ;;  %s529_s1 = inlined_call_operand.hbm [shape: f32[128,256], index: 1, kind: input, shape index: {}]   ;;  %s530_s2 = inlined_call_operand.vmem [shape: f32[1,256], index: 2, kind: input, shape index: {}]   ;;  %s531_s3 = inlined_call_operand.hbm [shape: f32[128,128], index: 3, kind: input, shape index: {}]   ;;  %s532_s4 = inlined_call_operand.vmem [shape: f32[16,128], index: 4, kind: output, shape index: {}]  }
   0x1   :  { %10 = vsyncpa [#allocation5], 0  ;;  %s455_s15 = smov [#allocation2]   ;;  %s407_s19 = scalar_lea.hbm %s529_s1, 4096 }
   0x2   :  { %s18_s16 = sshll.u32 %s455_s15, 4  ;;  %p408_p0 = scmp.ne.s32.totalorder %s529_s1, %s407_s19  ;;  %s19_s16 = int_to_ptr.vmem [resolvable:$true] %s18_s16 }
   0x3   :  { %p411_p1 = scmp.lt.u32.totalorder %s407_s19, %s529_s1 }
   0x5   :  { %p413_p2 = pnand %p411_p1, %p408_p0 }
   0x7   :  { %416 = shalt.err (!%p413_p2)
}
   0x8   :  { %s417_s24 = scalar_lea.vmem %s19_s16, 4096  ;;  %p422_p4 = scmp.lt.s32.totalorder %s19_s16, %s19_s16 }
   0x9   :  { %p418_p3 = scmp.ne.s32.totalorder %s19_s16, %s417_s24  ;;  %p423_p5 = scmp.lt.s32.totalorder %s417_s24, %s417_s24 }
   0xb   :  { %p424_p6 = por %p423_p5, %p422_p4 }
   0xd   :  { %p425_p7 = pnand %p424_p6, %p418_p3 }
   0xf   :  { %428 = shalt.err (!%p425_p7)
}
  0x10   :  { %s456_s25 = smov 256   ;;  %s457_s26 = smov 16  }
  0x11   :  { %24 = dma.hbm_to_vmem [thread:$0]  %s529_s1, 4096, %s19_s16, [#allocation3], %s456_s25, %s456_s25, %s457_s26  }
  0x12   :  { %s458_s29 = smov [#allocation4]   ;;  %s429_s7 = scalar_lea.hbm %s531_s3, 2048 }
  0x13   :  { %s32_s30 = sshll.u32 %s458_s29, 4  ;;  %p430_p8 = scmp.ne.s32.totalorder %s531_s3, %s429_s7  ;;  %s33_s30 = int_to_ptr.vmem [resolvable:$true] %s32_s30 }
  0x14   :  { %p433_p9 = scmp.lt.u32.totalorder %s429_s7, %s531_s3 }
  0x16   :  { %p435_p10 = pnand %p433_p9, %p430_p8 }
  0x18   :  { %438 = shalt.err (!%p435_p10)
}
  0x19   :  { %s439_s12 = scalar_lea.vmem %s33_s30, 2048  ;;  %p444_p12 = scmp.lt.s32.totalorder %s33_s30, %s33_s30 }
  0x1a   :  { %p440_p11 = scmp.ne.s32.totalorder %s33_s30, %s439_s12  ;;  %p445_p13 = scmp.lt.s32.totalorder %s439_s12, %s439_s12 }
  0x1c   :  { %p446_p0 = por %p445_p13, %p444_p12 }
  0x1e   :  { %p447_p1 = pnand %p446_p0, %p440_p11 }
  0x20   :  { %450 = shalt.err (!%p447_p1)
}
  0x21   :  { %s459_s1 = smov 128   ;;  %s460_s13 = smov 8  }
  0x22   :  { %38 = dma.hbm_to_vmem [thread:$0]  %s531_s3, 2048, %s33_s30, [#allocation5], %s459_s1, %s459_s1, %s460_s13  }
  0x23   :  { %451 = dma.done.wait [#allocation3], 4096  }
  0x24   :  { %452 = vsyncadd [#allocation3], 4294963200 }
  0x25   :  { %453 = dma.done.wait [#allocation5], 2048  }
  0x26   :  { %454 = vsyncadd [#allocation5], 4294965248  ;;  %v461_v0 = vmov 0.0   ;;  %v48_v1 = vld [vmem:[#allocation2 + $0x8] sm:$0xff]  ;;  %v50_v2 = vld [vmem:[#allocation2 + $0x18] sm:$0xff] }
  0x27   :  { %155 = vmatprep.mubr.f32.mxu0 %v461_v0  ;;  %v47_v3 = vld [vmem:[#allocation2] sm:$0xff]  ;;  %v332_v4 = vpack.c.bf16 %v50_v2, %v48_v1  ;;  %v49_v5 = vld [vmem:[#allocation2 + $0x10] sm:$0xff]  ;;  %v52_v6 = vld [vmem:[#allocation2 + $0x28] sm:$0xff] }
  0x28   :  { %v54_v7 = vld [vmem:[#allocation2 + $0x38] sm:$0xff]  ;;  %v334_v8 = vpack.c.bf16 %v49_v5, %v47_v3  ;;  %v51_v10 = vld [vmem:[#allocation2 + $0x20] sm:$0xff]  ;;  %v53_v11 = vld [vmem:[#allocation2 + $0x30] sm:$0xff] }
  0x29   :  { %v336_v9 = vpack.c.bf16 %v54_v7, %v52_v6  ;;  %v56_v12 = vld [vmem:[#allocation2 + $0x48] sm:$0xff]  ;;  %333 = vmatprep.subr.bf16.mxu0 %v332_v4  ;;  %v58_v13 = vld [vmem:[#allocation2 + $0x58] sm:$0xff]  ;;  %v338_v14 = vpack.c.bf16 %v53_v11, %v51_v10  ;;  %v55_v16 = vld [vmem:[#allocation2 + $0x40] sm:$0xff]  ;;  %v81_v11 = vlaneseq }
  0x2a   :  { %335 = vmatpush1.bf16.msra.mxu0 %v334_v8  ;;  %v340_v15 = vpack.c.bf16 %v58_v13, %v56_v12  ;;  %v57_v17 = vld [vmem:[#allocation2 + $0x50] sm:$0xff]  ;;  %v60_v18 = vld [vmem:[#allocation2 + $0x68] sm:$0xff]  ;;  %v62_v19 = vld [vmem:[#allocation2 + $0x78] sm:$0xff] }
  0x2b   :  { %337 = vmatprep.subr.bf16.mxu0 %v336_v9  ;;  %v342_v20 = vpack.c.bf16 %v57_v17, %v55_v16  ;;  %v344_v21 = vpack.c.bf16 %v62_v19, %v60_v18  ;;  %v59_v22 = vld [vmem:[#allocation2 + $0x60] sm:$0xff]  ;;  %v61_v23 = vld [vmem:[#allocation2 + $0x70] sm:$0xff]  ;;  %v64_v24 = vld [vmem:[#allocation2 + $0x88] sm:$0xff]  ;;  %v82_v12 = vshrl.u32 %v81_v11, 7 }
  0x2c   :  { %v66_v25 = vld [vmem:[#allocation2 + $0x98] sm:$0xff]  ;;  %v178_v26 = vld [vmem:[#allocation4] sm:$0xff]  ;;  %v179_v27 = vld [vmem:[#allocation4 + $0x8] sm:$0xff]  ;;  %v346_v28 = vpack.c.bf16 %v61_v23, %v59_v22 }
  0x2d   :  { %v364_v29 = vpack.c.bf16 %v179_v27, %v178_v26  ;;  %v180_v30 = vld [vmem:[#allocation4 + $0x10] sm:$0xff]  ;;  %v181_v31 = vld [vmem:[#allocation4 + $0x18] sm:$0xff]  ;;  %v348_v32 = vpack.c.bf16 %v66_v25, %v64_v24  ;;  %v63_v33 = vld [vmem:[#allocation2 + $0x80] sm:$0xff]  ;;  %v87_v13 = vsub.s32 1, %v82_v12 }
  0x2e   :  { %339 = vmatpush1.bf16.msra.mxu0 %v338_v14  ;;  %v65_v34 = vld [vmem:[#allocation2 + $0x90] sm:$0xff]  ;;  %v368_v35 = vpack.c.bf16 %v181_v31, %v180_v30  ;;  %v68_v36 = vld [vmem:[#allocation2 + $0xa8] sm:$0xff]  ;;  %v70_v37 = vld [vmem:[#allocation2 + $0xb8] sm:$0xff] }
  0x2f   :  { %341 = vmatprep.subr.bf16.mxu0 %v340_v15  ;;  %365 = vmatprep.subr.bf16.mxu1 %v364_v29  ;;  %v350_v38 = vpack.c.bf16 %v65_v34, %v63_v33  ;;  %v352_v39 = vpack.c.bf16 %v70_v37, %v68_v36  ;;  %v67_v40 = vld [vmem:[#allocation2 + $0xa0] sm:$0xff]  ;;  %v69_v41 = vld [vmem:[#allocation2 + $0xb0] sm:$0xff]  ;;  %v72_v42 = vld [vmem:[#allocation2 + $0xc8] sm:$0xff] }
  0x30   :  { %367 = vmatpush3.bf16.msra.mxu1 %v364_v29  ;;  %v74_v43 = vld [vmem:[#allocation2 + $0xd8] sm:$0xff]  ;;  %v354_v44 = vpack.c.bf16 %v69_v41, %v67_v40  ;;  %v71_v46 = vld [vmem:[#allocation2 + $0xc0] sm:$0xff]  ;;  %v73_v47 = vld [vmem:[#allocation2 + $0xd0] sm:$0xff] }
  0x31   :  { %369 = vmatprep.subr.bf16.mxu1 %v368_v35  ;;  %v356_v45 = vpack.c.bf16 %v74_v43, %v72_v42  ;;  %v76_v48 = vld [vmem:[#allocation2 + $0xe8] sm:$0xff]  ;;  %v78_v49 = vld [vmem:[#allocation2 + $0xf8] sm:$0xff]  ;;  %v358_v50 = vpack.c.bf16 %v73_v47, %v71_v46  ;;  %v75_v52 = vld [vmem:[#allocation2 + $0xe0] sm:$0xff] }
  0x32   :  { %343 = vmatpush1.bf16.msra.mxu0 %v342_v20  ;;  %v360_v51 = vpack.c.bf16 %v78_v49, %v76_v48  ;;  %v77_v53 = vld [vmem:[#allocation2 + $0xf0] sm:$0xff]  ;;  %v45_v55 = vld [vmem:[%s528_s0] sm:$0xff]  ;;  %v46_v56 = vld [vmem:[%s528_s0 + $0x8] sm:$0xff] }
  0x33   :  { %345 = vmatprep.subr.bf16.mxu0 %v344_v21  ;;  %v362_v54 = vpack.c.bf16 %v77_v53, %v75_v52  ;;  %v182_v57 = vld [vmem:[#allocation4 + $0x20] sm:$0xff]  ;;  %v183_v58 = vld [vmem:[#allocation4 + $0x28] sm:$0xff]  ;;  %v184_v60 = vld [vmem:[#allocation4 + $0x30] sm:$0xff] }
  0x34   :  { %371 = vmatpush3.bf16.msra.mxu1 %v368_v35  ;;  %v372_v59 = vpack.c.bf16 %v183_v58, %v182_v57  ;;  %v185_v61 = vld [vmem:[#allocation4 + $0x38] sm:$0xff]  ;;  %v186_v63 = vld [vmem:[#allocation4 + $0x40] sm:$0xff]  ;;  %v187_v1 = vld [vmem:[#allocation4 + $0x48] sm:$0xff] }
  0x35   :  { %v376_v62 = vpack.c.bf16 %v185_v61, %v184_v60  ;;  %v380_v2 = vpack.c.bf16 %v187_v1, %v186_v63  ;;  %v189_v3 = vld [vmem:[#allocation4 + $0x58] sm:$0xff]  ;;  %v190_v5 = vld [vmem:[#allocation4 + $0x60] sm:$0xff]  ;;  %v191_v6 = vld [vmem:[#allocation4 + $0x68] sm:$0xff] }
  0x36   :  { %347 = vmatpush1.bf16.msra.mxu0 %v346_v28  ;;  %373 = vmatprep.subr.bf16.mxu1 %v372_v59  ;;  %v388_v7 = vpack.c.bf16 %v191_v6, %v190_v5  ;;  %v192_v8 = vld [vmem:[#allocation4 + $0x70] sm:$0xff]  ;;  %v193_v9 = vld [vmem:[#allocation4 + $0x78] sm:$0xff]  ;;  %v79_v14 = vld [vmem:[%s530_s2] sm:$0x3] }
  0x37   :  { %349 = vmatprep.subr.bf16.mxu0 %v348_v32  ;;  %v392_v10 = vpack.c.bf16 %v193_v9, %v192_v8  ;;  %v88_v15 = vrot.slane %v79_v14, %v87_v13  ;;  %v83_v32 = vsub.s32 0, %v82_v12 }
  0x38   :  { %375 = vmatpush3.bf16.msra.mxu1 %v372_v59 }
  0x39   :  { %377 = vmatprep.subr.bf16.mxu1 %v376_v62  ;;  %v84_v33 = vrot.slane %v79_v14, %v83_v32 }
  0x3a   :  { %351 = vmatpush1.bf16.msra.mxu0 %v350_v38 }
  0x3b   :  { %353 = vmatprep.subr.bf16.mxu0 %v352_v39 }
  0x3c   :  { %379 = vmatpush3.bf16.msra.mxu1 %v376_v62 }
  0x3d   :  { %381 = vmatprep.subr.bf16.mxu1 %v380_v2 }
  0x3e   :  { %355 = vmatpush1.bf16.msra.mxu0 %v354_v44 }
  0x3f   :  { %357 = vmatprep.subr.bf16.mxu0 %v356_v45 }
  0x40   :  { %383 = vmatpush3.bf16.msra.mxu1 %v380_v2 }
  0x42   :  { %359 = vmatpush1.bf16.msra.mxu0 %v358_v50 }
  0x43   :  { %361 = vmatprep.subr.bf16.mxu0 %v360_v51 }
  0x46   :  { %363 = vmatpush1.bf16.msra.mxu0 %v362_v54 }
  0x49   :  { %156 = vmatmul.mubr.f32.vlgmr.msra.gmra.mrb[0].mxu0 %v45_v55 }
  0x4a   :  { %161 = vmatprep.mubr.f32.mxu0 %v461_v0  ;;  %v188_v0 = vld [vmem:[#allocation4 + $0x50] sm:$0xff] }
  0x4b   :  { %v384_v4 = vpack.c.bf16 %v189_v3, %v188_v0 }
  0x4d   :  { %162 = vmatmul.mubr.f32.gmra.mrb[2].mxu0 %v46_v56  ;;  %385 = vmatprep.subr.bf16.mxu1 %v384_v4 }
  0x4e   :  { %387 = vmatpush3.bf16.msra.mxu1 %v384_v4 }
  0x4f   :  { %389 = vmatprep.subr.bf16.mxu1 %v388_v7 }
  0x52   :  { %391 = vmatpush3.bf16.msra.mxu1 %v388_v7 }
  0x53   :  { %393 = vmatprep.subr.bf16.mxu1 %v392_v10 }
  0x56   :  { %395 = vmatpush3.bf16.msra.mxu1 %v392_v10 }
 0x11c   :  { %v157_v16 = vpop.f32.mrb[0].mxu0 }
 0x11d   :  { %v159_v17 = vpop.f32.mrb[1].mxu0  ;;  %v158_v35 = vadd.f32 %v157_v16, %v84_v33 }
 0x11e   :  { %v160_v18 = vadd.f32 %v159_v17, %v88_v15 }
 0x120   :  { %v170_v19 = vmul.f32 0.70710677, %v160_v18  ;;  %v163_v20 = vpop.f32.mrb[2].mxu0  ;;  %v168_v25 = vmul.f32 0.5, %v160_v18 }
 0x121   :  { %v165_v21 = vpop.f32.mrb[3].mxu0  ;;  %v164_v34 = vadd.f32 %v163_v20, %v84_v33 }
 0x122   :  { %403 = verf.f32 %v170_v19  ;;  %v166_v22 = vadd.f32 %v165_v21, %v88_v15 }
 0x124   :  { %v171_v23 = vmul.f32 0.70710677, %v166_v22  ;;  %v169_v29 = vmul.f32 0.5, %v166_v22 }
 0x126   :  { %405 = verf.f32 %v171_v23 }
 0x12c   :  { %v404_v24 = vpop.eup %403 }
 0x12d   :  { %v174_v26 = vadd.f32 1.0, %v404_v24 }
 0x12f   :  { %v176_v27 = vmul.f32 %v174_v26, %v168_v25 }
 0x130   :  { %v406_v28 = vpop.eup %405 }
 0x131   :  { %v175_v30 = vadd.f32 1.0, %v406_v28  ;;  %329 = vmatprep.mubr.f32.mxu1 %v176_v27 }
 0x133   :  { %v177_v31 = vmul.f32 %v175_v30, %v169_v29 }
 0x135   :  { %330 = vmatmul.mubr.f32.vlgmr.msra.gmra.mrb[0].mxu1 %v177_v31 }
 0x208   :  { %v331_v36 = vpop.f32.mrb[0].mxu1 }
 0x209   :  { %v270_v37 = vadd.f32 %v331_v36, %v164_v34  ;;  %v260_v38 = vpop.f32.mrb[1].mxu1 }
 0x20a   :  { %v269_v39 = vadd.f32 %v260_v38, %v158_v35 }
 0x20b   :  { %272 = vst [vmem:[%s532_s4 + $0x8] sm:$0xff] %v270_v37 }
 0x20c   :  { %271 = vst [vmem:[%s532_s4] sm:$0xff] %v269_v39 }
 0x20d   :  { %277 = vsyncpa [#allocation3], 1 }
 0x20e   :  { %278 = vsyncpa [#allocation5], 1 }

</bundles_post_ra>
